<compile_context>
chip_gen: v7x
topology: tpu7x:2x2x1
jax: 0.10.0
libtpu: 0.0.40
codegen_flags: <defaults>
</compile_context>

<pallas_src>
import jax
import jax.numpy as jnp
from jax.experimental import pallas as pl
from jax.experimental.pallas import tpu as pltpu

_LANE = 128
_SUBLANE = 8


def _round_up(x, m):
    return ((x + m - 1) // m) * m


def mlp_kernel(x_ref, w1_ref, b1_ref, w2_ref, b2_ref, o_ref):
    """fc1 + ReLU + fc2 on one (block_m, K) batch tile, everything in VMEM."""
    x = x_ref[...]
    h = jnp.dot(x, w1_ref[...], preferred_element_type=jnp.float32)
    h = jnp.maximum(h + b1_ref[...], 0.0)                   # f32 bias + ReLU
    logits = jnp.dot(h.astype(w2_ref.dtype), w2_ref[...],
                     preferred_element_type=jnp.float32)
    o_ref[...] = (logits + b2_ref[...]).astype(o_ref.dtype)


def prepare_params(w1, b1, w2, b2, *, param_dtype=None):
    """Pad (to 128-lane multiples) + pre-transpose the weights ONCE.

    Hoisted out of the per-call path so repeated forward passes don't pay an
    extra HBM read+write + transpose over the weights each call. Padded hidden
    columns get w=0, b=0 -> ReLU(0)=0, and the matching padded w2 rows are 0,
    so the padding never leaks into real outputs.
    """
    if param_dtype is None:
        param_dtype = w1.dtype               # keep f32 by default (exact numerics)
    hidden, in_features = w1.shape
    out_features = w2.shape[0]
    k_p = _round_up(in_features, _LANE)
    h_p = _round_up(hidden, _LANE)
    n_p = _round_up(out_features, _LANE)

    w1_t = (jnp.zeros((k_p, h_p), param_dtype)
            .at[:in_features, :hidden].set(w1.T.astype(param_dtype)))
    w2_t = (jnp.zeros((h_p, n_p), param_dtype)
            .at[:hidden, :out_features].set(w2.T.astype(param_dtype)))
    b1_p = jnp.zeros((1, h_p), jnp.float32).at[0, :hidden].set(b1.astype(jnp.float32))
    b2_p = (jnp.zeros((1, n_p), jnp.float32)
            .at[0, :out_features].set(b2.astype(jnp.float32)))
    return (w1_t, b1_p, w2_t, b2_p), (in_features, hidden, out_features)


def _pick_block_m(batch):
    """Batch tile size: sublane/MXU friendly, amortizes per-grid-step overhead."""
    if batch <= _SUBLANE:
        return _SUBLANE
    if batch < 128:
        return _round_up(batch, _SUBLANE)        # single grid step, no 8-row drip
    bm = 512                                     # big tile: ~HBM-roofline DMA pipeline
    while bm > 128 and pl.cdiv(batch, bm) < 2:   # keep >=2 steps so both v7x TCs work
        bm //= 2
    return bm


def mlp_forward_prepared(x_nchw, prepared, *, block_m=None, x_dtype=None):
    (w1_t, b1_p, w2_t, b2_p), (in_features, hidden, out_features) = prepared
    B = x_nchw.shape[0]
    out_dtype = x_nchw.dtype
    x2d = x_nchw.reshape(B, -1)                  # torch.flatten(x, 1), row-major
    assert x2d.shape[1] == in_features
    if x_dtype is not None:
        x2d = x2d.astype(x_dtype)                # opt-in bf16 activations (perf runs)

    k_p, h_p = w1_t.shape
    n_p = w2_t.shape[1]

    # Only pad the feature (K) axis of x if it isn't already lane-aligned
    # (in_features = 1024 here -> no extra HBM pass over x). The batch axis is
    # never pre-padded: Pallas masks the ragged trailing batch block.
    if k_p != in_features:
        x_in = jnp.zeros((B, k_p), x2d.dtype).at[:, :in_features].set(x2d)
    else:
        x_in = x2d

    if block_m is None:
        block_m = _pick_block_m(B)
    grid = (pl.cdiv(B, block_m),)

    # VMEM footprint: double-buffered x/out tiles + single-buffered params.
    vmem_bytes = (2 * block_m * k_p * x_in.dtype.itemsize
                  + 2 * block_m * n_p * jnp.dtype(out_dtype).itemsize
                  + (k_p * h_p + h_p * n_p) * w1_t.dtype.itemsize
                  + (h_p + n_p) * 4)
    vmem_limit = int(min(100 * 2**20,
                         max(32 * 2**20, int(1.25 * vmem_bytes) + (1 << 20))))
    # Note: for in_features so large that w1 alone overflows VMEM, add a K grid
    # axis ("arbitrary", last) with an f32 accumulator instead of keeping w1
    # fully resident. Not needed at these sizes.

    flops = 2 * B * k_p * h_p + 2 * B * h_p * n_p
    bytes_accessed = (x_in.size * x_in.dtype.itemsize
                      + w1_t.size * w1_t.dtype.itemsize
                      + w2_t.size * w2_t.dtype.itemsize
                      + b1_p.size * 4 + b2_p.size * 4
                      + B * n_p * jnp.dtype(out_dtype).itemsize)

    # Constant-index params: single buffer (their block never changes).
    resident = dict(pipeline_mode=pl.Buffered(buffer_count=1))

    out_pad = pl.pallas_call(
        mlp_kernel,
        out_shape=jax.ShapeDtypeStruct((B, n_p), out_dtype),
        grid_spec=pltpu.PrefetchScalarGridSpec(
            num_scalar_prefetch=0,
            grid=grid,
            in_specs=[
                pl.BlockSpec((block_m, k_p), lambda i: (i, 0)),           # x tile/step
                pl.BlockSpec((k_p, h_p), lambda i: (0, 0), **resident),   # w1 resident
                pl.BlockSpec((1, h_p), lambda i: (0, 0), **resident),     # b1 resident
                pl.BlockSpec((h_p, n_p), lambda i: (0, 0), **resident),   # w2 resident
                pl.BlockSpec((1, n_p), lambda i: (0, 0), **resident),     # b2 resident
            ],
            out_specs=pl.BlockSpec((block_m, n_p), lambda i: (i, 0)),
        ),
        compiler_params=pltpu.CompilerParams(
            dimension_semantics=("parallel",),     # batch tiles shard across TCs (v7x)
            vmem_limit_bytes=vmem_limit,
        ),
        cost_estimate=pl.CostEstimate(
            flops=flops, transcendentals=0, bytes_accessed=bytes_accessed),
    )(x_in, w1_t, b1_p, w2_t, b2_p)

    # Lane-dense (128-wide, unmasked) store inside the kernel; trim padding here.
    return out_pad[:, :out_features]


def mlp_forward(x_nchw, w1, b1, w2, b2, *, block_m=None, param_dtype=None,
                x_dtype=None):
    """x_nchw: (B,C,H,W); w1: (hidden, in_features); w2: (out, hidden).

    param_dtype / x_dtype default to f32 (exact numerics); pass jnp.bfloat16
    for perf runs (f32 MXU accumulation is kept either way).
    """
    prepared = prepare_params(w1, b1, w2, b2, param_dtype=param_dtype)
    return mlp_forward_prepared(x_nchw, prepared, block_m=block_m, x_dtype=x_dtype)


def mlp_reference(x_nchw, w1, b1, w2, b2):
    x = x_nchw.reshape(x_nchw.shape[0], -1)
    h = jnp.maximum(x @ w1.T + b1, 0.0)
    return h @ w2.T + b2


if __name__ == "__main__":
    key = jax.random.PRNGKey(0)
    k_x, k_w1, k_b1, k_w2, k_b2 = jax.random.split(key, 5)

    # Small shapes consistent with the module's forward:
    B, C, H, W = 2, 4, 16, 16
    in_features = C * H * W                # 1024
    hidden = 32
    out_features = 10

    x = jax.random.normal(k_x, (B, C, H, W), dtype=jnp.float32)

    # Deterministic PyTorch-style init: U(-1/sqrt(fan_in), 1/sqrt(fan_in))
    bound1 = 1.0 / (in_features ** 0.5)
    w1 = jax.random.uniform(k_w1, (hidden, in_features), jnp.float32, -bound1, bound1)
    b1 = jax.random.uniform(k_b1, (hidden,), jnp.float32, -bound1, bound1)
    bound2 = 1.0 / (hidden ** 0.5)
    w2 = jax.random.uniform(k_w2, (out_features, hidden), jnp.float32, -bound2, bound2)
    b2 = jax.random.uniform(k_b2, (out_features,), jnp.float32, -bound2, bound2)

    out = mlp_forward(x, w1, b1, w2, b2)
    jax.block_until_ready(out)

    ref = mlp_reference(x, w1, b1, w2, b2)
    assert out.shape == (B, out_features), out.shape
    assert jnp.allclose(out, ref, atol=1e-5, rtol=1e-5), "mismatch vs reference"

    print("KERNEL_OK")
</pallas_src>

<mosaic_0001>
module attributes {stable_mosaic.version = 11 : i64} {
  func.func @mlp_kernel(%arg0: i32, %arg1: memref<8x1024xf32, #tpu.memory_space<vmem>>, %arg2: memref<1024x128xf32, #tpu.memory_space<vmem>>, %arg3: memref<1x128xf32, #tpu.memory_space<vmem>>, %arg4: memref<128x128xf32, #tpu.memory_space<vmem>>, %arg5: memref<1x128xf32, #tpu.memory_space<vmem>>, %arg6: memref<8x128xf32, #tpu.memory_space<vmem>>) attributes {dimension_semantics = [#tpu.dimension_semantics<parallel>], iteration_bounds = array<i64: 1>, scalar_prefetch = 0 : i64, scratch_operands = 0 : i64, tpu.core_type = #tpu.core_type<tc>, window_params = [{transform_indices = @transform_0, window_bounds = array<i64: 8, 1024>}, {pipeline_mode = #tpu.pipeline_mode<synchronous>, transform_indices = @transform_1, window_bounds = array<i64: 1024, 128>}, {pipeline_mode = #tpu.pipeline_mode<synchronous>, transform_indices = @transform_2, window_bounds = array<i64: 1, 128>}, {pipeline_mode = #tpu.pipeline_mode<synchronous>, transform_indices = @transform_3, window_bounds = array<i64: 128, 128>}, {pipeline_mode = #tpu.pipeline_mode<synchronous>, transform_indices = @transform_4, window_bounds = array<i64: 1, 128>}, {transform_indices = @transform_5, window_bounds = array<i64: 8, 128>}]} {
    %c0 = arith.constant 0 : index
    %c0_0 = arith.constant 0 : index
    %0 = vector.load %arg1[%c0, %c0_0] : memref<8x1024xf32, #tpu.memory_space<vmem>>, vector<8x1024xf32>
    %c0_1 = arith.constant 0 : index
    %c0_2 = arith.constant 0 : index
    %1 = vector.load %arg2[%c0_1, %c0_2] : memref<1024x128xf32, #tpu.memory_space<vmem>>, vector<1024x128xf32>
    %cst = arith.constant dense<0.000000e+00> : vector<8x128xf32>
    %2 = tpu.matmul %0, %1, %cst {dimension_numbers = #tpu.dot_dimension_numbers<[1], [0], [0], [1], [0, 0, 1, 1], [], []>} : vector<8x1024xf32>, vector<1024x128xf32>, vector<8x128xf32> -> vector<8x128xf32>
    %c0_3 = arith.constant 0 : index
    %c0_4 = arith.constant 0 : index
    %3 = vector.load %arg3[%c0_3, %c0_4] : memref<1x128xf32, #tpu.memory_space<vmem>>, vector<1x128xf32>
    %4 = vector.broadcast %3 : vector<1x128xf32> to vector<8x128xf32>
    %5 = arith.addf %2, %4 : vector<8x128xf32>
    %cst_5 = arith.constant 0.000000e+00 : f32
    %6 = vector.broadcast %cst_5 : f32 to vector<8x128xf32>
    %7 = arith.maximumf %5, %6 : vector<8x128xf32>
    %c0_6 = arith.constant 0 : index
    %c0_7 = arith.constant 0 : index
    %8 = vector.load %arg4[%c0_6, %c0_7] : memref<128x128xf32, #tpu.memory_space<vmem>>, vector<128x128xf32>
    %cst_8 = arith.constant dense<0.000000e+00> : vector<8x128xf32>
    %9 = tpu.matmul %7, %8, %cst_8 {dimension_numbers = #tpu.dot_dimension_numbers<[1], [0], [0], [1], [0, 0, 1, 1], [], []>} : vector<8x128xf32>, vector<128x128xf32>, vector<8x128xf32> -> vector<8x128xf32>
    %c0_9 = arith.constant 0 : index
    %c0_10 = arith.constant 0 : index
    %10 = vector.load %arg5[%c0_9, %c0_10] : memref<1x128xf32, #tpu.memory_space<vmem>>, vector<1x128xf32>
    %11 = vector.broadcast %10 : vector<1x128xf32> to vector<8x128xf32>
    %12 = arith.addf %9, %11 : vector<8x128xf32>
    %c0_11 = arith.constant 0 : index
    %c0_12 = arith.constant 0 : index
    %13 = vector.load %arg6[%c0_11, %c0_12] : memref<8x128xf32, #tpu.memory_space<vmem>>, vector<8x128xf32>
    tpu.vector_store %arg6[%c0_11, %c0_12], %12 {strides = array<i32>} : memref<8x128xf32, #tpu.memory_space<vmem>>, vector<8x128xf32>,
    return
  }
  func.func @transform_0(%arg0: i32) -> (i32, i32) {
    %c0_i32 = arith.constant 0 : i32
    %c0_i32_0 = arith.constant 0 : i32
    return %arg0, %c0_i32 : i32, i32
  }
  func.func @transform_1(%arg0: i32) -> (i32, i32) {
    %c0_i32 = arith.constant 0 : i32
    %c0_i32_0 = arith.constant 0 : i32
    %c0_i32_1 = arith.constant 0 : i32
    return %c0_i32, %c0_i32_0 : i32, i32
  }
  func.func @transform_2(%arg0: i32) -> (i32, i32) {
    %c0_i32 = arith.constant 0 : i32
    %c0_i32_0 = arith.constant 0 : i32
    %c0_i32_1 = arith.constant 0 : i32
    return %c0_i32, %c0_i32_0 : i32, i32
  }
  func.func @transform_3(%arg0: i32) -> (i32, i32) {
    %c0_i32 = arith.constant 0 : i32
    %c0_i32_0 = arith.constant 0 : i32
    %c0_i32_1 = arith.constant 0 : i32
    return %c0_i32, %c0_i32_0 : i32, i32
  }
  func.func @transform_4(%arg0: i32) -> (i32, i32) {
    %c0_i32 = arith.constant 0 : i32
    %c0_i32_0 = arith.constant 0 : i32
    %c0_i32_1 = arith.constant 0 : i32
    return %c0_i32, %c0_i32_0 : i32, i32
  }
  func.func @transform_5(%arg0: i32) -> (i32, i32) {
    %c0_i32 = arith.constant 0 : i32
    %c0_i32_0 = arith.constant 0 : i32
    return %arg0, %c0_i32 : i32, i32
  }
}

</mosaic_0001>

<bundles_post_ra>
// kernel: tpu_custom_call.1
= control target key start
LH: loop header
LB: loop body
LE: loop exit
PB: predicated region body
PF: predicated region fallthrough
CT: control target
= control target key end

     0   :  { %10 = vsyncpa [#allocation3], 0  ;;  %s1266_s0 = inlined_call_operand.hbm [shape: f32[2,1024], index: 0, kind: input, shape index: {}]   ;;  %s1267_s1 = inlined_call_operand.hbm [shape: f32[1024,128], index: 1, kind: input, shape index: {}]   ;;  %s1268_s2 = inlined_call_operand.vmem [shape: f32[1,128], index: 2, kind: input, shape index: {}]   ;;  %s1269_s3 = inlined_call_operand.hbm [shape: f32[128,128], index: 3, kind: input, shape index: {}]   ;;  %s1270_s4 = inlined_call_operand.vmem [shape: f32[1,128], index: 4, kind: input, shape index: {}]   ;;  %s1271_s5 = inlined_call_operand.hbm [shape: f32[2,128], index: 5, kind: output, shape index: {}]  }
   0x1   :  { %11 = vsyncpa [#allocation6], 0 }
   0x2   :  { %12 = vsyncpa [#allocation4], 0 }
   0x3   :  { %17 = vsyncadd [#allocation3], 768  ;;  %s1152_s18 = smov [#allocation5]   ;;  %s1058_s22 = scalar_lea.hbm %s1267_s1, 16384 }
   0x4   :  { %s30_s19 = sshll.u32 %s1152_s18, 4  ;;  %p1059_p0 = scmp.ne.s32.totalorder %s1267_s1, %s1058_s22  ;;  %s31_s19 = int_to_ptr.vmem [resolvable:$true] %s30_s19 }
   0x5   :  { %p1062_p1 = scmp.lt.u32.totalorder %s1058_s22, %s1267_s1 }
   0x7   :  { %p1064_p2 = pnand %p1062_p1, %p1059_p0 }
   0x9   :  { %1067 = shalt.err (!%p1064_p2)
}
   0xa   :  { %s1068_s27 = scalar_lea.vmem %s31_s19, 16384  ;;  %p1073_p4 = scmp.lt.s32.totalorder %s31_s19, %s31_s19 }
   0xb   :  { %p1069_p3 = scmp.ne.s32.totalorder %s31_s19, %s1068_s27  ;;  %p1074_p5 = scmp.lt.s32.totalorder %s1068_s27, %s1068_s27 }
   0xd   :  { %p1075_p6 = por %p1074_p5, %p1073_p4 }
   0xf   :  { %p1076_p7 = pnand %p1075_p6, %p1069_p3 }
  0x11   :  { %1079 = shalt.err (!%p1076_p7)
}
  0x12   :  { %s1153_s28 = smov 128   ;;  %s1154_s29 = smov 8  }
  0x13   :  { %36 = dma.hbm_to_vmem [thread:$0]  %s1267_s1, 16384, %s31_s19, [#allocation6], %s1153_s28, %s1153_s28, %s1154_s29  }
  0x14   :  { %s1155_s7 = smov [#allocation2]   ;;  %s1080_s11 = scalar_lea.hbm %s1266_s0, 256 }
  0x15   :  { %s18_s8 = sshll.u32 %s1155_s7, 4  ;;  %p1081_p8 = scmp.ne.s32.totalorder %s1266_s0, %s1080_s11  ;;  %s19_s8 = int_to_ptr.vmem [resolvable:$true] %s18_s8 }
  0x16   :  { %p1084_p9 = scmp.lt.u32.totalorder %s1080_s11, %s1266_s0 }
  0x18   :  { %p1086_p10 = pnand %p1084_p9, %p1081_p8 }
  0x1a   :  { %1089 = shalt.err (!%p1086_p10)
}
  0x1b   :  { %s1090_s16 = scalar_lea.vmem %s19_s8, 256  ;;  %s1094_s1 = scalar_lea.vmem %s19_s8, 1024 }
  0x1c   :  { %p1091_p11 = scmp.ne.s32.totalorder %s19_s8, %s1090_s16  ;;  %p1095_p12 = scmp.lt.s32.totalorder %s19_s8, %s19_s8 }
  0x1d   :  { %p1096_p13 = scmp.lt.s32.totalorder %s1094_s1, %s1090_s16 }
  0x1f   :  { %p1097_p0 = por %p1096_p13, %p1095_p12 }
  0x21   :  { %p1098_p1 = pnand %p1097_p0, %p1091_p11 }
  0x23   :  { %1101 = shalt.err (!%p1098_p1)
}
  0x24   :  { %s1156_s17 = smov 256   ;;  %s1157_s18 = smov 16  }
  0x25   :  { %24 = dma.hbm_to_vmem [thread:$0]  %s1266_s0, 256, %s19_s8, [#allocation3], %s1156_s17, %s1156_s17, %s1157_s18  }
  0x26   :  { %s1158_s21 = smov [#allocation7]   ;;  %s1102_s25 = scalar_lea.hbm %s1269_s3, 2048 }
  0x27   :  { %s44_s22 = sshll.u32 %s1158_s21, 4  ;;  %p1103_p2 = scmp.ne.s32.totalorder %s1269_s3, %s1102_s25  ;;  %s45_s22 = int_to_ptr.vmem [resolvable:$true] %s44_s22 }
  0x28   :  { %p1106_p3 = scmp.lt.u32.totalorder %s1102_s25, %s1269_s3 }
  0x2a   :  { %p1108_p4 = pnand %p1106_p3, %p1103_p2 }
  0x2c   :  { %1111 = shalt.err (!%p1108_p4)
}
  0x2d   :  { %s1112_s7 = scalar_lea.vmem %s45_s22, 2048  ;;  %p1117_p6 = scmp.lt.s32.totalorder %s45_s22, %s45_s22 }
  0x2e   :  { %p1113_p5 = scmp.ne.s32.totalorder %s45_s22, %s1112_s7  ;;  %p1118_p7 = scmp.lt.s32.totalorder %s1112_s7, %s1112_s7 }
  0x30   :  { %p1119_p8 = por %p1118_p7, %p1117_p6 }
  0x32   :  { %p1120_p9 = pnand %p1119_p8, %p1113_p5 }
  0x34   :  { %1123 = shalt.err (!%p1120_p9)
}
  0x35   :  { %50 = dma.hbm_to_vmem [thread:$0]  %s1269_s3, 2048, %s45_s22, [#allocation6], %s1153_s28, %s1153_s28, %s1154_s29  }
  0x36   :  { %1146 = dma.done.wait [#allocation3], 1024  }
  0x37   :  { %1147 = vsyncadd [#allocation3], 4294966272 }
  0x38   :  { %1148 = dma.done.wait [#allocation6], 18432  }
  0x39   :  { %1149 = vsyncadd [#allocation6], 4294948864  ;;  %v86_v0 = vld [vmem:[#allocation5 + $0x80] sm:$0xff]  ;;  %v87_v1 = vld [vmem:[#allocation5 + $0x88] sm:$0xff]  ;;  %v1159_v51 = vmov 1983009808   ;;  %v220_v53 = vlaneseq }
  0x3a   :  { %v70_v2 = vld [vmem:[#allocation5] sm:$0xff]  ;;  %v880_v3 = vpack.c.bf16 %v87_v1, %v86_v0  ;;  %v71_v4 = vld [vmem:[#allocation5 + $0x8] sm:$0xff]  ;;  %v88_v11 = vld [vmem:[#allocation5 + $0x90] sm:$0xff]  ;;  %v218_v52 = vunpack.c.l.s4 %v1159_v51  ;;  %vm1161_vm0 = vmmov 0  }
  0x3b   :  { %v118_v5 = vld [vmem:[#allocation5 + $0x180] sm:$0xff]  ;;  %v119_v6 = vld [vmem:[#allocation5 + $0x188] sm:$0xff]  ;;  %v882_v7 = vpack.c.bf16 %v71_v4, %v70_v2  ;;  %v89_v13 = vld [vmem:[#allocation5 + $0x98] sm:$0xff] }
  0x3c   :  { %v912_v8 = vpack.c.bf16 %v119_v6, %v118_v5  ;;  %v102_v9 = vld [vmem:[#allocation5 + $0x100] sm:$0xff]  ;;  %v103_v10 = vld [vmem:[#allocation5 + $0x108] sm:$0xff]  ;;  %881 = vmatprep.subr.bf16.mxu0 %v880_v3  ;;  %v72_v14 = vld [vmem:[#allocation5 + $0x10] sm:$0xff]  ;;  %v884_v16 = vpack.c.bf16 %v89_v13, %v88_v11  ;;  %v219_v2 = vunpack.c.0.s8 %v218_v52  ;;  %v221_v3 = vshrl.u32 %v220_v53, 7 }
  0x3d   :  { %v914_v12 = vpack.c.bf16 %v103_v10, %v102_v9  ;;  %v73_v15 = vld [vmem:[#allocation5 + $0x18] sm:$0xff]  ;;  %883 = vmatpush3.bf16.msra.mxu0 %v882_v7  ;;  %v120_v18 = vld [vmem:[#allocation5 + $0x190] sm:$0xff]  ;;  %v90_v23 = vld [vmem:[#allocation5 + $0xa0] sm:$0xff] }
  0x3e   :  { %913 = vmatprep.subr.bf16.mxu1 %v912_v8  ;;  %v886_v17 = vpack.c.bf16 %v73_v15, %v72_v14  ;;  %v121_v19 = vld [vmem:[#allocation5 + $0x198] sm:$0xff]  ;;  %v104_v20 = vld [vmem:[#allocation5 + $0x110] sm:$0xff]  ;;  %v91_v24 = vld [vmem:[#allocation5 + $0xa8] sm:$0xff]  ;;  %885 = vmatprep.subr.bf16.mxu0 %v884_v16 }
  0x3f   :  { %915 = vmatpush3.bf16.msra.mxu1 %v914_v12  ;;  %v916_v21 = vpack.c.bf16 %v121_v19, %v120_v18  ;;  %v105_v22 = vld [vmem:[#allocation5 + $0x118] sm:$0xff]  ;;  %v888_v26 = vpack.c.bf16 %v91_v24, %v90_v23  ;;  %v74_v27 = vld [vmem:[#allocation5 + $0x20] sm:$0xff]  ;;  %v75_v28 = vld [vmem:[#allocation5 + $0x28] sm:$0xff] }
  0x40   :  { %v918_v25 = vpack.c.bf16 %v105_v22, %v104_v20  ;;  %v122_v29 = vld [vmem:[#allocation5 + $0x1a0] sm:$0xff]  ;;  %v123_v30 = vld [vmem:[#allocation5 + $0x1a8] sm:$0xff]  ;;  %v890_v33 = vpack.c.bf16 %v75_v28, %v74_v27  ;;  %v92_v35 = vld [vmem:[#allocation5 + $0xb0] sm:$0xff] }
  0x41   :  { %917 = vmatprep.subr.bf16.mxu1 %v916_v21  ;;  %v106_v31 = vld [vmem:[#allocation5 + $0x120] sm:$0xff]  ;;  %v107_v32 = vld [vmem:[#allocation5 + $0x128] sm:$0xff]  ;;  %887 = vmatpush3.bf16.msra.mxu0 %v886_v17  ;;  %v920_v34 = vpack.c.bf16 %v123_v30, %v122_v29  ;;  %v93_v36 = vld [vmem:[#allocation5 + $0xb8] sm:$0xff]  ;;  %v1238_v21 = vsub.s32 %v219_v2, %v221_v3 }
  0x42   :  { %v76_v37 = vld [vmem:[#allocation5 + $0x30] sm:$0xff]  ;;  %889 = vmatprep.subr.bf16.mxu0 %v888_v26  ;;  %v922_v38 = vpack.c.bf16 %v107_v32, %v106_v31  ;;  %v892_v39 = vpack.c.bf16 %v93_v36, %v92_v35  ;;  %v77_v40 = vld [vmem:[#allocation5 + $0x38] sm:$0xff]  ;;  %v94_v46 = vld [vmem:[#allocation5 + $0xc0] sm:$0xff] }
  0x43   :  { %919 = vmatpush3.bf16.msra.mxu1 %v918_v25  ;;  %v124_v41 = vld [vmem:[#allocation5 + $0x1b0] sm:$0xff]  ;;  %v125_v42 = vld [vmem:[#allocation5 + $0x1b8] sm:$0xff]  ;;  %v95_v47 = vld [vmem:[#allocation5 + $0xc8] sm:$0xff]  ;;  %v894_v48 = vpack.c.bf16 %v77_v40, %v76_v37 }
  0x44   :  { %921 = vmatprep.subr.bf16.mxu1 %v920_v34  ;;  %v924_v43 = vpack.c.bf16 %v125_v42, %v124_v41  ;;  %v108_v44 = vld [vmem:[#allocation5 + $0x130] sm:$0xff]  ;;  %v109_v45 = vld [vmem:[#allocation5 + $0x138] sm:$0xff]  ;;  %v126_v49 = vld [vmem:[#allocation5 + $0x1c0] sm:$0xff]  ;;  %v896_v55 = vpack.c.bf16 %v95_v47, %v94_v46 }
  0x45   :  { %891 = vmatpush3.bf16.msra.mxu0 %v890_v33  ;;  %v127_v50 = vld [vmem:[#allocation5 + $0x1c8] sm:$0xff]  ;;  %v926_v54 = vpack.c.bf16 %v109_v45, %v108_v44  ;;  %v78_v56 = vld [vmem:[#allocation5 + $0x40] sm:$0xff]  ;;  %v96_v61 = vld [vmem:[#allocation5 + $0xd0] sm:$0xff] }
  0x46   :  { %893 = vmatprep.subr.bf16.mxu0 %v892_v39  ;;  %v79_v57 = vld [vmem:[#allocation5 + $0x48] sm:$0xff]  ;;  %v110_v58 = vld [vmem:[#allocation5 + $0x140] sm:$0xff]  ;;  %v928_v59 = vpack.c.bf16 %v127_v50, %v126_v49  ;;  %v97_v62 = vld [vmem:[#allocation5 + $0xd8] sm:$0xff] }
  0x47   :  { %923 = vmatpush3.bf16.msra.mxu1 %v922_v38  ;;  %v111_v60 = vld [vmem:[#allocation5 + $0x148] sm:$0xff]  ;;  %v128_v63 = vld [vmem:[#allocation5 + $0x1d0] sm:$0xff]  ;;  %v129_v0 = vld [vmem:[#allocation5 + $0x1d8] sm:$0xff]  ;;  %v898_v1 = vpack.c.bf16 %v79_v57, %v78_v56  ;;  %v900_v5 = vpack.c.bf16 %v97_v62, %v96_v61 }
  0x48   :  { %925 = vmatprep.subr.bf16.mxu1 %v924_v43  ;;  %v930_v4 = vpack.c.bf16 %v111_v60, %v110_v58  ;;  %v80_v6 = vld [vmem:[#allocation5 + $0x50] sm:$0xff]  ;;  %v81_v7 = vld [vmem:[#allocation5 + $0x58] sm:$0xff]  ;;  %v932_v9 = vpack.c.bf16 %v129_v0, %v128_v63  ;;  %v98_v11 = vld [vmem:[#allocation5 + $0xe0] sm:$0xff] }
  0x49   :  { %895 = vmatpush3.bf16.msra.mxu0 %v894_v48  ;;  %v112_v8 = vld [vmem:[#allocation5 + $0x150] sm:$0xff]  ;;  %v113_v10 = vld [vmem:[#allocation5 + $0x158] sm:$0xff]  ;;  %v99_v12 = vld [vmem:[#allocation5 + $0xe8] sm:$0xff]  ;;  %v902_v17 = vpack.c.bf16 %v81_v7, %v80_v6 }
  0x4a   :  { %897 = vmatprep.subr.bf16.mxu0 %v896_v55  ;;  %v82_v13 = vld [vmem:[#allocation5 + $0x60] sm:$0xff]  ;;  %v83_v14 = vld [vmem:[#allocation5 + $0x68] sm:$0xff]  ;;  %v100_v20 = vld [vmem:[#allocation5 + $0xf0] sm:$0xff]  ;;  %v934_v22 = vpack.c.bf16 %v113_v10, %v112_v8  ;;  %v904_v23 = vpack.c.bf16 %v99_v12, %v98_v11 }
  0x4b   :  { %927 = vmatpush3.bf16.msra.mxu1 %v926_v54  ;;  %v130_v15 = vld [vmem:[#allocation5 + $0x1e0] sm:$0xff]  ;;  %v131_v16 = vld [vmem:[#allocation5 + $0x1e8] sm:$0xff]  ;;  %v101_v24 = vld [vmem:[#allocation5 + $0xf8] sm:$0xff]  ;;  %v906_v30 = vpack.c.bf16 %v83_v14, %v82_v13 }
  0x4c   :  { %929 = vmatprep.subr.bf16.mxu1 %v928_v59  ;;  %v114_v18 = vld [vmem:[#allocation5 + $0x160] sm:$0xff]  ;;  %v115_v19 = vld [vmem:[#allocation5 + $0x168] sm:$0xff]  ;;  %v936_v25 = vpack.c.bf16 %v131_v16, %v130_v15  ;;  %v132_v27 = vld [vmem:[#allocation5 + $0x1f0] sm:$0xff]  ;;  %v908_v35 = vpack.c.bf16 %v101_v24, %v100_v20 }
  0x4d   :  { %899 = vmatpush3.bf16.msra.mxu0 %v898_v1  ;;  %v1046_v26 = vld [vmem:[#allocation2] ss:$16 sps:$4 sm:$0xff]   ;;  %v133_v28 = vld [vmem:[#allocation5 + $0x1f8] sm:$0xff]  ;;  %v1050_v32 = vld [vmem:[#allocation2 + $0x4] ss:$16 sps:$4 sm:$0xff]   ;;  %v938_v34 = vpack.c.bf16 %v115_v19, %v114_v18 }
  0x4e   :  { %901 = vmatprep.subr.bf16.mxu0 %v900_v5  ;;  %v1048_v29 = vld [vmem:[#allocation2 + $0x20] ss:$16 sps:$4 sm:$0xff]   ;;  %v223_v31 = vrot.slane %v1046_v26, %v1238_v21  ;;  %v1051_v33 = vld [vmem:[#allocation2 + $0x24] ss:$16 sps:$4 sm:$0xff]   ;;  %v85_v37 = vld [vmem:[#allocation5 + $0x78] sm:$0xff]  ;;  %v940_v40 = vpack.c.bf16 %v133_v28, %v132_v27  ;;  %v230_v44 = vrot.slane %v1050_v32, %v1238_v21 }
  0x4f   :  { %931 = vmatpush3.bf16.msra.mxu1 %v930_v4  ;;  %v84_v36 = vld [vmem:[#allocation5 + $0x70] sm:$0xff]  ;;  %v237_v39 = vrot.slane %v1048_v29, %v1238_v21  ;;  %v117_v41 = vld [vmem:[#allocation5 + $0x178] sm:$0xff]  ;;  %v150_v42 = vld [vmem:[#allocation5 + $0x280] sm:$0xff]  ;;  %v244_v45 = vrot.slane %v1051_v33, %v1238_v21 }
  0x50   :  { %933 = vmatprep.subr.bf16.mxu1 %v932_v9  ;;  %v116_v38 = vld [vmem:[#allocation5 + $0x170] sm:$0xff]  ;;  %v151_v43 = vld [vmem:[#allocation5 + $0x288] sm:$0xff]  ;;  %v182_v47 = vld [vmem:[#allocation5 + $0x380] sm:$0xff]  ;;  %v910_v49 = vpack.c.bf16 %v85_v37, %v84_v36 }
  0x51   :  { %903 = vmatpush3.bf16.msra.mxu0 %v902_v17  ;;  %v246_v46 = vcombine.high %v223_v31, %v237_v39  ;;  %v183_v48 = vld [vmem:[#allocation5 + $0x388] sm:$0xff]  ;;  %v248_v50 = vcombine.high %v230_v44, %v244_v45  ;;  %v942_v51 = vpack.c.bf16 %v117_v41, %v116_v38  ;;  %v944_v52 = vpack.c.bf16 %v151_v43, %v150_v42  ;;  %v134_v53 = vld [vmem:[#allocation5 + $0x200] sm:$0xff]  ;;  %v152_v58 = vld [vmem:[#allocation5 + $0x290] sm:$0xff] }
  0x52   :  { %905 = vmatprep.subr.bf16.mxu0 %v904_v23  ;;  %v135_v54 = vld [vmem:[#allocation5 + $0x208] sm:$0xff]  ;;  %v166_v55 = vld [vmem:[#allocation5 + $0x300] sm:$0xff]  ;;  %v976_v56 = vpack.c.bf16 %v183_v48, %v182_v47  ;;  %v153_v59 = vld [vmem:[#allocation5 + $0x298] sm:$0xff]  ;;  %v245_v60 = vcombine.low %v223_v31, %v237_v39  ;;  %v247_v0 = vcombine.low %v230_v44, %v244_v45 }
  0x53   :  { %935 = vmatpush3.bf16.msra.mxu1 %v934_v22  ;;  %357 = vmatprep.mubr.f32.mxu0 %v246_v46  ;;  %v167_v57 = vld [vmem:[#allocation5 + $0x308] sm:$0xff]  ;;  %v184_v61 = vld [vmem:[#allocation5 + $0x390] sm:$0xff]  ;;  %v185_v62 = vld [vmem:[#allocation5 + $0x398] sm:$0xff]  ;;  %v946_v63 = vpack.c.bf16 %v135_v54, %v134_v53  ;;  %v948_v2 = vpack.c.bf16 %v153_v59, %v152_v58 }
  0x54   :  { %937 = vmatprep.subr.bf16.mxu1 %v936_v25  ;;  %427 = vmatprep.mubr.f32.mxu1 %v248_v50  ;;  %v978_v1 = vpack.c.bf16 %v167_v57, %v166_v55  ;;  %v136_v3 = vld [vmem:[#allocation5 + $0x210] sm:$0xff]  ;;  %v137_v4 = vld [vmem:[#allocation5 + $0x218] sm:$0xff]  ;;  %v980_v6 = vpack.c.bf16 %v185_v62, %v184_v61  ;;  %v154_v8 = vld [vmem:[#allocation5 + $0x2a0] sm:$0xff] }
  0x55   :  { %907 = vmatpush3.bf16.msra.mxu0 %v906_v30  ;;  %v168_v5 = vld [vmem:[#allocation5 + $0x310] sm:$0xff]  ;;  %v169_v7 = vld [vmem:[#allocation5 + $0x318] sm:$0xff]  ;;  %v155_v9 = vld [vmem:[#allocation5 + $0x2a8] sm:$0xff]  ;;  %v950_v12 = vpack.c.bf16 %v137_v4, %v136_v3 }
  0x56   :  { %909 = vmatprep.subr.bf16.mxu0 %v908_v35  ;;  %v186_v10 = vld [vmem:[#allocation5 + $0x3a0] sm:$0xff]  ;;  %v187_v11 = vld [vmem:[#allocation5 + $0x3a8] sm:$0xff]  ;;  %v982_v13 = vpack.c.bf16 %v169_v7, %v168_v5  ;;  %v952_v14 = vpack.c.bf16 %v155_v9, %v154_v8  ;;  %v156_v20 = vld [vmem:[#allocation5 + $0x2b0] sm:$0xff] }
  0x57   :  { %939 = vmatpush3.bf16.msra.mxu1 %v938_v34  ;;  %v138_v15 = vld [vmem:[#allocation5 + $0x220] sm:$0xff]  ;;  %v139_v16 = vld [vmem:[#allocation5 + $0x228] sm:$0xff]  ;;  %v984_v18 = vpack.c.bf16 %v187_v11, %v186_v10  ;;  %v157_v22 = vld [vmem:[#allocation5 + $0x2b8] sm:$0xff] }
  0x58   :  { %941 = vmatprep.subr.bf16.mxu1 %v940_v40  ;;  %v170_v17 = vld [vmem:[#allocation5 + $0x320] sm:$0xff]  ;;  %v171_v19 = vld [vmem:[#allocation5 + $0x328] sm:$0xff]  ;;  %v188_v23 = vld [vmem:[#allocation5 + $0x3b0] sm:$0xff]  ;;  %v954_v25 = vpack.c.bf16 %v139_v16, %v138_v15  ;;  %v956_v27 = vpack.c.bf16 %v157_v22, %v156_v20 }
  0x59   :  { %911 = vmatpush3.bf16.msra.mxu0 %v910_v49  ;;  %v189_v24 = vld [vmem:[#allocation5 + $0x3b8] sm:$0xff]  ;;  %v986_v26 = vpack.c.bf16 %v171_v19, %v170_v17  ;;  %v140_v28 = vld [vmem:[#allocation5 + $0x230] sm:$0xff]  ;;  %v158_v33 = vld [vmem:[#allocation5 + $0x2c0] sm:$0xff] }
  0x5a   :  { %945 = vmatprep.subr.bf16.mxu0 %v944_v52  ;;  %v141_v29 = vld [vmem:[#allocation5 + $0x238] sm:$0xff]  ;;  %v172_v30 = vld [vmem:[#allocation5 + $0x330] sm:$0xff]  ;;  %v988_v31 = vpack.c.bf16 %v189_v24, %v188_v23  ;;  %v159_v34 = vld [vmem:[#allocation5 + $0x2c8] sm:$0xff] }
  0x5b   :  { %943 = vmatpush3.bf16.msra.mxu1 %v942_v51  ;;  %v173_v32 = vld [vmem:[#allocation5 + $0x338] sm:$0xff]  ;;  %v142_v35 = vld [vmem:[#allocation5 + $0x240] sm:$0xff]  ;;  %v143_v36 = vld [vmem:[#allocation5 + $0x248] sm:$0xff]  ;;  %v958_v40 = vpack.c.bf16 %v141_v29, %v140_v28  ;;  %v960_v45 = vpack.c.bf16 %v159_v34, %v158_v33  ;;  %v1160_v34 = vmov 0.0|0.0  }
  0x5c   :  { %977 = vmatprep.subr.bf16.mxu1 %v976_v56  ;;  %358 = vmatmul.mubr.f32.vlgmr.msra.gmra.mrb[0].mxu0 %v245_v60  ;;  %v190_v37 = vld [vmem:[#allocation5 + $0x3c0] sm:$0xff]  ;;  %v191_v38 = vld [vmem:[#allocation5 + $0x3c8] sm:$0xff]  ;;  %v160_v42 = vld [vmem:[#allocation5 + $0x2d0] sm:$0xff]  ;;  %v990_v44 = vpack.c.bf16 %v173_v32, %v172_v30  ;;  %v962_v53 = vpack.c.bf16 %v143_v36, %v142_v35 }
  0x5d   :  { %947 = vmatpush3.bf16.msra.mxu0 %v946_v63  ;;  %v174_v39 = vld [vmem:[#allocation5 + $0x340] sm:$0xff]  ;;  %v175_v41 = vld [vmem:[#allocation5 + $0x348] sm:$0xff]  ;;  %v161_v43 = vld [vmem:[#allocation5 + $0x2d8] sm:$0xff]  ;;  %v992_v48 = vpack.c.bf16 %v191_v38, %v190_v37 }
  0x5e   :  { %428 = vmatmul.mubr.f32.vlgmr.msra.gmra.mrb[0].mxu1 %v247_v0  ;;  %949 = vmatprep.subr.bf16.mxu0 %v948_v2  ;;  %v192_v46 = vld [vmem:[#allocation5 + $0x3d0] sm:$0xff]  ;;  %v193_v47 = vld [vmem:[#allocation5 + $0x3d8] sm:$0xff]  ;;  %v994_v54 = vpack.c.bf16 %v175_v41, %v174_v39  ;;  %v964_v55 = vpack.c.bf16 %v161_v43, %v160_v42  ;;  %v163_v2 = vld [vmem:[#allocation5 + $0x2e8] sm:$0xff] }
  0x5f   :  { %979 = vmatpush3.bf16.msra.mxu1 %v978_v1  ;;  %v1052_v49 = vld [vmem:[#allocation2 + $0x8] ss:$16 sps:$4 sm:$0xff]   ;;  %v1056_v51 = vld [vmem:[#allocation2 + $0xc] ss:$16 sps:$4 sm:$0xff]   ;;  %v144_v57 = vld [vmem:[#allocation5 + $0x250] sm:$0xff]  ;;  %v996_v63 = vpack.c.bf16 %v193_v47, %v192_v46 }
  0x60   :  { %981 = vmatprep.subr.bf16.mxu1 %v980_v6  ;;  %v1054_v50 = vld [vmem:[#allocation2 + $0x28] ss:$16 sps:$4 sm:$0xff]   ;;  %v1057_v52 = vld [vmem:[#allocation2 + $0x2c] ss:$16 sps:$4 sm:$0xff]   ;;  %v259_v56 = vrot.slane %v1052_v49, %v1238_v21  ;;  %v176_v59 = vld [vmem:[#allocation5 + $0x350] sm:$0xff]  ;;  %v266_v61 = vrot.slane %v1056_v51, %v1238_v21 }
  0x61   :  { %951 = vmatpush3.bf16.msra.mxu0 %v950_v12  ;;  %v145_v58 = vld [vmem:[#allocation5 + $0x258] sm:$0xff]  ;;  %v273_v60 = vrot.slane %v1054_v50, %v1238_v21  ;;  %v280_v62 = vrot.slane %v1057_v52, %v1238_v21  ;;  %v162_v1 = vld [vmem:[#allocation5 + $0x2e0] sm:$0xff]  ;;  %v195_v4 = vld [vmem:[#allocation5 + $0x3e8] sm:$0xff] }
  0x62   :  { %953 = vmatprep.subr.bf16.mxu0 %v952_v14  ;;  %v177_v0 = vld [vmem:[#allocation5 + $0x358] sm:$0xff]  ;;  %v194_v3 = vld [vmem:[#allocation5 + $0x3e0] sm:$0xff]  ;;  %v966_v7 = vpack.c.bf16 %v145_v58, %v144_v57  ;;  %v968_v9 = vpack.c.bf16 %v163_v2, %v162_v1  ;;  %v147_v11 = vld [vmem:[#allocation5 + $0x268] sm:$0xff] }
  0x63   :  { %983 = vmatpush3.bf16.msra.mxu1 %v982_v13  ;;  %v282_v5 = vcombine.high %v259_v56, %v273_v60  ;;  %v284_v6 = vcombine.high %v266_v61, %v280_v62  ;;  %v998_v8 = vpack.c.bf16 %v177_v0, %v176_v59  ;;  %v146_v10 = vld [vmem:[#allocation5 + $0x260] sm:$0xff]  ;;  %v1000_v21 = vpack.c.bf16 %v195_v4, %v194_v3  ;;  %v179_v13 = vld [vmem:[#allocation5 + $0x368] sm:$0xff]  ;;  %v164_v14 = vld [vmem:[#allocation5 + $0x2f0] sm:$0xff] }
  0x64   :  { %985 = vmatprep.subr.bf16.mxu1 %v984_v18  ;;  %v178_v12 = vld [vmem:[#allocation5 + $0x360] sm:$0xff]  ;;  %v165_v15 = vld [vmem:[#allocation5 + $0x2f8] sm:$0xff]  ;;  %v196_v16 = vld [vmem:[#allocation5 + $0x3f0] sm:$0xff]  ;;  %v970_v18 = vpack.c.bf16 %v147_v11, %v146_v10  ;;  %v281_v29 = vcombine.low %v259_v56, %v273_v60  ;;  %v283_v30 = vcombine.low %v266_v61, %v280_v62  ;;  %v1162_v56 = vmov 0.0  }
  0x65   :  { %955 = vmatpush3.bf16.msra.mxu0 %v954_v25  ;;  %497 = vmatprep.mubr.f32.mxu0 %v282_v5  ;;  %v197_v17 = vld [vmem:[#allocation5 + $0x3f8] sm:$0xff]  ;;  %v1002_v19 = vpack.c.bf16 %v179_v13, %v178_v12  ;;  %v972_v20 = vpack.c.bf16 %v165_v15, %v164_v14  ;;  %v148_v22 = vld [vmem:[#allocation5 + $0x270] sm:$0xff]  ;;  %v575_v32 = vld [vmem:[#allocation7 + $0x8] sm:$0xff] }
  0x66   :  { %957 = vmatprep.subr.bf16.mxu0 %v956_v27  ;;  %567 = vmatprep.mubr.f32.mxu1 %v284_v6  ;;  %v149_v23 = vld [vmem:[#allocation5 + $0x278] sm:$0xff]  ;;  %v1004_v24 = vpack.c.bf16 %v197_v17, %v196_v16  ;;  %v180_v25 = vld [vmem:[#allocation5 + $0x370] sm:$0xff]  ;;  %v578_v38 = vld [vmem:[#allocation7 + $0x20] sm:$0xff] }
  0x67   :  { %987 = vmatpush3.bf16.msra.mxu1 %v986_v26  ;;  %v181_v26 = vld [vmem:[#allocation5 + $0x378] sm:$0xff]  ;;  %v974_v27 = vpack.c.bf16 %v149_v23, %v148_v22  ;;  %v576_v33 = vld [vmem:[#allocation7 + $0x10] sm:$0xff]  ;;  %v579_v39 = vld [vmem:[#allocation7 + $0x28] sm:$0xff] }
  0x68   :  { %989 = vmatprep.subr.bf16.mxu1 %v988_v31  ;;  %v1006_v28 = vpack.c.bf16 %v181_v26, %v180_v25  ;;  %v574_v31 = vld [vmem:[#allocation7] sm:$0xff]  ;;  %v577_v36 = vld [vmem:[#allocation7 + $0x18] sm:$0xff]  ;;  %v580_v41 = vld [vmem:[#allocation7 + $0x30] sm:$0xff] }
  0x69   :  { %959 = vmatpush3.bf16.msra.mxu0 %v958_v40  ;;  %v1009_v35 = vpack.c.bf16 %v575_v32, %v574_v31  ;;  %v1012_v37 = vpack.c.bf16 %v577_v36, %v576_v33  ;;  %v1015_v40 = vpack.c.bf16 %v579_v39, %v578_v38  ;;  %v581_v42 = vld [vmem:[#allocation7 + $0x38] sm:$0xff]  ;;  %v584_v47 = vld [vmem:[#allocation7 + $0x50] sm:$0xff]  ;;  %v586_v50 = vld [vmem:[#allocation7 + $0x60] sm:$0xff] }
  0x6a   :  { %961 = vmatprep.subr.bf16.mxu0 %v960_v45  ;;  %v1018_v43 = vpack.c.bf16 %v581_v42, %v580_v41  ;;  %v583_v45 = vld [vmem:[#allocation7 + $0x48] sm:$0xff]  ;;  %v686_v58 = vld [vmem:[%s1268_s2] ss:$0 sm:$0xff] }
  0x6b   :  { %991 = vmatpush3.bf16.msra.mxu1 %v990_v44  ;;  %v582_v44 = vld [vmem:[#allocation7 + $0x40] sm:$0xff]  ;;  %v587_v51 = vld [vmem:[#allocation7 + $0x68] sm:$0xff] }
  0x6c   :  { %993 = vmatprep.subr.bf16.mxu1 %v992_v48  ;;  %v1021_v46 = vpack.c.bf16 %v583_v45, %v582_v44  ;;  %v585_v48 = vld [vmem:[#allocation7 + $0x58] sm:$0xff]  ;;  %v1027_v52 = vpack.c.bf16 %v587_v51, %v586_v50  ;;  %v687_v11 = vld [vmem:[%s1270_s4] ss:$0 sm:$0xff] }
  0x6d   :  { %963 = vmatpush3.bf16.msra.mxu0 %v962_v53  ;;  %v1024_v49 = vpack.c.bf16 %v585_v48, %v584_v47  ;;  %v588_v53 = vld [vmem:[#allocation7 + $0x70] sm:$0xff] }
  0x6e   :  { %965 = vmatprep.subr.bf16.mxu0 %v964_v55 }
  0x6f   :  { %995 = vmatpush3.bf16.msra.mxu1 %v994_v54  ;;  %v589_v54 = vld [vmem:[#allocation7 + $0x78] sm:$0xff] }
  0x70   :  { %997 = vmatprep.subr.bf16.mxu1 %v996_v63  ;;  %v1030_v55 = vpack.c.bf16 %v589_v54, %v588_v53 }
  0x71   :  { %967 = vmatpush3.bf16.msra.mxu0 %v966_v7 }
  0x72   :  { %969 = vmatprep.subr.bf16.mxu0 %v968_v9 }
  0x73   :  { %999 = vmatpush3.bf16.msra.mxu1 %v998_v8 }
  0x74   :  { %1001 = vmatprep.subr.bf16.mxu1 %v1000_v21 }
  0x75   :  { %971 = vmatpush3.bf16.msra.mxu0 %v970_v18 }
  0x76   :  { %973 = vmatprep.subr.bf16.mxu0 %v972_v20 }
  0x77   :  { %1003 = vmatpush3.bf16.msra.mxu1 %v1002_v19 }
  0x78   :  { %1005 = vmatprep.subr.bf16.mxu1 %v1004_v24 }
  0x79   :  { %975 = vmatpush3.bf16.msra.mxu0 %v974_v27 }
  0x7a   :  { %1008 = vmatprep.subr.bf16.mxu0 %v1160_v34 }
  0x7b   :  { %1007 = vmatpush3.bf16.msra.mxu1 %v1006_v28 }
  0x7c   :  { %498 = vmatmul.mubr.f32.vlgmr.msra.gmra.mrb[2].mxu0 %v281_v29 }
  0x7d   :  { %1010 = vmatpush3.bf16.msra.mxu0 %v1009_v35  ;;  %877 = vmatprep.mubr.msk.f32.mxu0 %vm1161_vm0, %v1162_v56 }
  0x7e   :  { %568 = vmatmul.mubr.f32.vlgmr.msra.gmra.mrb[2].mxu1 %v283_v30  ;;  %1011 = vmatprep.subr.bf16.mxu0 %v1160_v34 }
  0x81   :  { %1013 = vmatpush3.bf16.msra.mxu0 %v1012_v37 }
  0x82   :  { %1014 = vmatprep.subr.bf16.mxu0 %v1160_v34 }
  0x85   :  { %1016 = vmatpush3.bf16.msra.mxu0 %v1015_v40 }
  0x86   :  { %1017 = vmatprep.subr.bf16.mxu0 %v1160_v34 }
  0x89   :  { %1019 = vmatpush3.bf16.msra.mxu0 %v1018_v43 }
  0x8a   :  { %1020 = vmatprep.subr.bf16.mxu0 %v1160_v34 }
  0x8d   :  { %1022 = vmatpush3.bf16.msra.mxu0 %v1021_v46 }
  0x8e   :  { %1023 = vmatprep.subr.bf16.mxu0 %v1160_v34 }
  0x91   :  { %1025 = vmatpush3.bf16.msra.mxu0 %v1024_v49 }
  0x92   :  { %1026 = vmatprep.subr.bf16.mxu0 %v1160_v34 }
  0x95   :  { %1028 = vmatpush3.bf16.msra.mxu0 %v1027_v52 }
  0x96   :  { %1029 = vmatprep.subr.bf16.mxu0 %v1160_v34 }
  0x99   :  { %1031 = vmatpush3.bf16.msra.mxu0 %v1030_v55 }
 0x12f   :  { %v720_v57 = vpop.f32.mrb[0].mxu0 }
 0x130   :  { %v721_v59 = vpop.f32.mrb[1].mxu0 }
 0x131   :  { %v755_v60 = vpop.f32.mrb[0].mxu1  ;;  %v722_v61 = vadd.f32 %v721_v59, %v720_v57 }
 0x132   :  { %v756_v62 = vpop.f32.mrb[1].mxu1 }
 0x133   :  { %v757_v63 = vadd.f32 %v756_v62, %v755_v60  ;;  %v360_v0 = vadd.f32 %v722_v61, %v686_v58 }
 0x135   :  { %v430_v1 = vadd.f32 %v757_v63, %v360_v0 }
 0x14f   :  { %v790_v2 = vpop.f32.mrb[2].mxu0 }
 0x150   :  { %v791_v3 = vpop.f32.mrb[3].mxu0 }
 0x151   :  { %v825_v4 = vpop.f32.mrb[2].mxu1  ;;  %v792_v5 = vadd.f32 %v791_v3, %v790_v2 }
 0x152   :  { %v826_v6 = vpop.f32.mrb[3].mxu1 }
 0x153   :  { %v827_v7 = vadd.f32 %v826_v6, %v825_v4  ;;  %v500_v8 = vadd.f32 %v792_v5, %v430_v1 }
 0x155   :  { %v570_v9 = vadd.f32 %v827_v7, %v500_v8 }
 0x157   :  { %v573_v10 = vmax.f32 %v570_v9, 0.0 }
 0x159   :  { %878 = vmatmul.mubr.f32.vlgmr.msra.gmra.mrb[4].mxu0 %v573_v10 }
 0x22c   :  { %v663_v12 = vpop.f32.mrb[4].mxu0 }
 0x22d   :  { %v664_v21 = vadd.f32 %v687_v11, %v663_v12  ;;  %v879_v13 = vpop.f32.mrb[5].mxu0 }
 0x22f   :  { %667 = vst [vmem:[#allocation8] sm:$0xff] %v664_v21 }
 0x230   :  { %672 = vsyncadd [#allocation4], 96  ;;  %s1163_s2 = smov [#allocation8]  }
 0x231   :  { %s673_s10 = sshll.u32 %s1163_s2, 4  ;;  %s674_s10 = int_to_ptr.vmem [resolvable:$true] %s673_s10 }
 0x232   :  { %s1124_s11 = scalar_lea.vmem %s674_s10, 32  ;;  %s1128_s12 = scalar_lea.vmem %s674_s10, 128 }
 0x233   :  { %p1125_p10 = scmp.ne.s32.totalorder %s674_s10, %s1124_s11  ;;  %p1129_p11 = scmp.lt.s32.totalorder %s674_s10, %s674_s10 }
 0x234   :  { %p1130_p12 = scmp.lt.s32.totalorder %s1128_s12, %s1124_s11 }
 0x236   :  { %p1131_p13 = por %p1130_p12, %p1129_p11 }
 0x238   :  { %p1132_p0 = pnand %p1131_p13, %p1125_p10 }
 0x23a   :  { %1135 = shalt.err (!%p1132_p0)
}
 0x23b   :  { %s1136_s4 = scalar_lea.hbm %s1271_s5, 32 }
 0x23c   :  { %p1137_p1 = scmp.ne.s32.totalorder %s1271_s5, %s1136_s4  ;;  %p1140_p2 = scmp.lt.u32.totalorder %s1136_s4, %s1271_s5 }
 0x23e   :  { %p1142_p3 = pnand %p1140_p2, %p1137_p1 }
 0x240   :  { %1145 = shalt.err (!%p1142_p3)
}
 0x241   :  { %s1164_s18 = smov 32   ;;  %s1165_s19 = smov 2  }
 0x242   :  { %679 = dma.vmem_to_hbm [thread:$0]  %s674_s10, 32, %s1271_s5, [#allocation4], %s1164_s18, %s1164_s18, %s1165_s19  }
 0x243   :  { %1150 = dma.done.wait [#allocation4], 128  }
 0x244   :  { %1151 = vsyncadd [#allocation4], 4294967168 }
 0x245   :  { %683 = vsyncpa [#allocation3], 1 }
 0x246   :  { %684 = vsyncpa [#allocation6], 1 }
 0x247   :  { %685 = vsyncpa [#allocation4], 1 }

</bundles_post_ra>
